<compile_context>
chip_gen: v5e
topology: v5e:2x2
jax: 0.10.0
libtpu: 0.0.40
codegen_flags: <defaults>
</compile_context>

<pallas_src>
import jax
import jax.numpy as jnp
import numpy as np
from jax.experimental import pallas as pl
from jax.experimental.pallas import tpu as pltpu

LANE = 128  # vreg lane width
SUB = 8     # sublane alignment


def _round_up(x, m):
    return ((x + m - 1) // m) * m


def _choose_tb(n):
    """Batch tile: multiple of 8, as large as useful, grid >= 2 when possible."""
    n8 = _round_up(max(int(n), 1), SUB)
    if n8 < 2 * SUB:
        return n8                                   # too small to split
    half = _round_up(-(-n8 // 2), SUB)              # ceil(n8/2) rounded to 8
    return max(SUB, min(256, half))                 # cap at 256 rows per step


def siamese_mlp_kernel(x1_ref, x2_ref, w1_ref, b1_ref, w2_ref, b2_ref,
                       w3_ref, b3_ref, o1_ref, o2_ref):
    # Whole 3-layer MLP hot path in-kernel: 3 MXU matmuls + bias + ReLU,
    # applied to a batch tile of each of the two Siamese inputs.
    w1 = w1_ref[...]
    b1 = b1_ref[...]
    w2 = w2_ref[...]
    b2 = b2_ref[...]
    w3 = w3_ref[...]
    b3 = b3_ref[...]

    def mlp(x):
        if x.dtype != jnp.float32:      # trace-time conditional: no-op for f32
            x = x.astype(jnp.float32)
        h = jnp.dot(x, w1, preferred_element_type=jnp.float32) + b1
        h = jnp.maximum(h, 0.0)
        h = jnp.dot(h, w2, preferred_element_type=jnp.float32) + b2
        h = jnp.maximum(h, 0.0)
        return jnp.dot(h, w3, preferred_element_type=jnp.float32) + b3

    o1_ref[...] = mlp(x1_ref[...]).astype(o1_ref.dtype)
    o2_ref[...] = mlp(x2_ref[...]).astype(o2_ref.dtype)


def siamese_forward(x1, x2, params):
    """SiameseNetwork.forward: shared MLP applied to x1 and x2 (one launch)."""
    w1, b1, w2, b2, w3, b3 = params
    n, d_in = x1.shape
    assert x2.shape == x1.shape
    hidden = w1.shape[1]
    mid = w2.shape[1]       # 256
    out_dim = w3.shape[1]   # 128

    # ---- lane-pad feature dims to multiples of 128 (exact: zero padding) ----
    d_in_p = _round_up(d_in, LANE)
    hidden_p = _round_up(hidden, LANE)
    mid_p = _round_up(mid, LANE)
    out_p = _round_up(out_dim, LANE)

    if d_in_p != d_in:
        x1 = jnp.pad(x1, ((0, 0), (0, d_in_p - d_in)))
        x2 = jnp.pad(x2, ((0, 0), (0, d_in_p - d_in)))
    w1p = jnp.pad(w1, ((0, d_in_p - d_in), (0, hidden_p - hidden)))
    b1p = jnp.pad(b1, ((0, 0), (0, hidden_p - hidden)))
    w2p = jnp.pad(w2, ((0, hidden_p - hidden), (0, mid_p - mid)))
    b2p = jnp.pad(b2, ((0, 0), (0, mid_p - mid)))
    w3p = jnp.pad(w3, ((0, mid_p - mid), (0, out_p - out_dim)))
    b3p = jnp.pad(b3, ((0, 0), (0, out_p - out_dim)))

    # ---- batch tiling -------------------------------------------------------
    tb = _choose_tb(n)
    n_pad = _round_up(n, tb)
    if n_pad != n:
        x1 = jnp.pad(x1, ((0, n_pad - n), (0, 0)))
        x2 = jnp.pad(x2, ((0, n_pad - n), (0, 0)))
    grid = (n_pad // tb,)

    # ---- cost estimate (both towers) ---------------------------------------
    layer_flops = d_in_p * hidden_p + hidden_p * mid_p + mid_p * out_p
    weight_elems = (d_in_p * hidden_p + hidden_p + hidden_p * mid_p + mid_p
                    + mid_p * out_p + out_p)
    cost = pl.CostEstimate(
        flops=4 * n_pad * layer_flops,                         # 2 towers * 2*N*K
        transcendentals=0,
        bytes_accessed=4 * (2 * n_pad * d_in_p + 2 * n_pad * out_p + weight_elems),
    )

    # ---- VMEM guard: raise scoped limit only if the footprint needs it ------
    act_bytes = 2 * 2 * tb * (d_in_p + out_p) * 4      # double-buffered in/out tiles
    wgt_bytes = 2 * weight_elems * 4                   # double-buffered weights
    live_bytes = 4 * tb * (hidden_p + mid_p) * 4       # f32 intermediates, 2 towers
    vmem_est = act_bytes + wgt_bytes + live_bytes
    vmem_limit = None
    if vmem_est > 16 * 1024 * 1024:
        vmem_limit = min(int(vmem_est * 3 // 2), 100 * 1024 * 1024)

    full = lambda i: (0, 0)   # weights/biases: one full-extent block per grid step
    tile = lambda i: (i, 0)   # activations: tile over batch

    out1, out2 = pl.pallas_call(
        siamese_mlp_kernel,
        out_shape=(jax.ShapeDtypeStruct((n_pad, out_p), x1.dtype),
                   jax.ShapeDtypeStruct((n_pad, out_p), x2.dtype)),
        grid_spec=pltpu.PrefetchScalarGridSpec(
            num_scalar_prefetch=0,
            grid=grid,
            in_specs=[
                pl.BlockSpec((tb, d_in_p), tile),        # x1 tile
                pl.BlockSpec((tb, d_in_p), tile),        # x2 tile
                pl.BlockSpec((d_in_p, hidden_p), full),  # W1
                pl.BlockSpec((1, hidden_p), full),       # b1
                pl.BlockSpec((hidden_p, mid_p), full),   # W2
                pl.BlockSpec((1, mid_p), full),          # b2
                pl.BlockSpec((mid_p, out_p), full),      # W3
                pl.BlockSpec((1, out_p), full),          # b3
            ],
            out_specs=[pl.BlockSpec((tb, out_p), tile),
                       pl.BlockSpec((tb, out_p), tile)],
        ),
        compiler_params=pltpu.CompilerParams(
            dimension_semantics=("parallel",),
            vmem_limit_bytes=vmem_limit),
        cost_estimate=cost,
    )(x1, x2, w1p, b1p, w2p, b2p, w3p, b3p)

    return out1[:n, :out_dim], out2[:n, :out_dim]


def init_params(key, input_dim, hidden_size):
    # Deterministic init mimicking PyTorch Linear default U(-1/sqrt(fan_in), +).
    # TODO(synk): optionally cast weights to bf16 on v6e/v7x for MXU throughput.
    dims = [(input_dim, hidden_size), (hidden_size, 256), (256, 128)]
    params = []
    for i, (fi, fo) in enumerate(dims):
        kw, kb = jax.random.split(jax.random.fold_in(key, i))
        bound = 1.0 / (fi ** 0.5)
        w = jax.random.uniform(kw, (fi, fo), jnp.float32, -bound, bound)
        b = jax.random.uniform(kb, (1, fo), jnp.float32, -bound, bound)
        params += [w, b]
    return tuple(params)


if __name__ == "__main__":
    key = jax.random.PRNGKey(0)
    input_dim, hidden_size, batch = 32, 32, 2

    params = init_params(key, input_dim, hidden_size)
    kx1, kx2 = jax.random.split(jax.random.fold_in(key, 100))
    x1 = jax.random.normal(kx1, (batch, input_dim), jnp.float32)
    x2 = jax.random.normal(kx2, (batch, input_dim), jnp.float32)

    out1, out2 = siamese_forward(x1, x2, params)
    jax.block_until_ready((out1, out2))
    assert out1.shape == (batch, 128) and out2.shape == (batch, 128)

    # Pure-JAX reference check.
    def ref_mlp(x):
        w1, b1, w2, b2, w3, b3 = params
        h = jnp.maximum(x @ w1 + b1, 0.0)
        h = jnp.maximum(h @ w2 + b2, 0.0)
        return h @ w3 + b3

    np.testing.assert_allclose(np.asarray(out1), np.asarray(ref_mlp(x1)),
                               rtol=1e-5, atol=1e-5)
    np.testing.assert_allclose(np.asarray(out2), np.asarray(ref_mlp(x2)),
                               rtol=1e-5, atol=1e-5)

    # Exercise a larger batch so the tiled (tb up to 256, grid >= 2) path runs.
    kb1, kb2 = jax.random.split(jax.random.fold_in(key, 200))
    xb1 = jax.random.normal(kb1, (300, input_dim), jnp.float32)
    xb2 = jax.random.normal(kb2, (300, input_dim), jnp.float32)
    ob1, ob2 = siamese_forward(xb1, xb2, params)
    jax.block_until_ready((ob1, ob2))
    np.testing.assert_allclose(np.asarray(ob1), np.asarray(ref_mlp(xb1)),
                               rtol=1e-5, atol=1e-5)
    np.testing.assert_allclose(np.asarray(ob2), np.asarray(ref_mlp(xb2)),
                               rtol=1e-5, atol=1e-5)

    print("KERNEL_OK")
</pallas_src>

<mosaic_0001>
module attributes {stable_mosaic.version = 11 : i64} {
  func.func @siamese_mlp_kernel(%arg0: i32, %arg1: memref<8x128xf32, #tpu.memory_space<vmem>>, %arg2: memref<8x128xf32, #tpu.memory_space<vmem>>, %arg3: memref<128x128xf32, #tpu.memory_space<vmem>>, %arg4: memref<1x128xf32, #tpu.memory_space<vmem>>, %arg5: memref<128x256xf32, #tpu.memory_space<vmem>>, %arg6: memref<1x256xf32, #tpu.memory_space<vmem>>, %arg7: memref<256x128xf32, #tpu.memory_space<vmem>>, %arg8: memref<1x128xf32, #tpu.memory_space<vmem>>, %arg9: memref<8x128xf32, #tpu.memory_space<vmem>>, %arg10: memref<8x128xf32, #tpu.memory_space<vmem>>) attributes {dimension_semantics = [#tpu.dimension_semantics<parallel>], iteration_bounds = array<i64: 1>, scalar_prefetch = 0 : i64, scratch_operands = 0 : i64, tpu.core_type = #tpu.core_type<tc>, window_params = [{transform_indices = @transform_0, window_bounds = array<i64: 8, 128>}, {transform_indices = @transform_1, window_bounds = array<i64: 8, 128>}, {pipeline_mode = #tpu.pipeline_mode<synchronous>, transform_indices = @transform_2, window_bounds = array<i64: 128, 128>}, {pipeline_mode = #tpu.pipeline_mode<synchronous>, transform_indices = @transform_3, window_bounds = array<i64: 1, 128>}, {pipeline_mode = #tpu.pipeline_mode<synchronous>, transform_indices = @transform_4, window_bounds = array<i64: 128, 256>}, {pipeline_mode = #tpu.pipeline_mode<synchronous>, transform_indices = @transform_5, window_bounds = array<i64: 1, 256>}, {pipeline_mode = #tpu.pipeline_mode<synchronous>, transform_indices = @transform_6, window_bounds = array<i64: 256, 128>}, {pipeline_mode = #tpu.pipeline_mode<synchronous>, transform_indices = @transform_7, window_bounds = array<i64: 1, 128>}, {transform_indices = @transform_8, window_bounds = array<i64: 8, 128>}, {transform_indices = @transform_9, window_bounds = array<i64: 8, 128>}]} {
    %c0 = arith.constant 0 : index
    %c0_0 = arith.constant 0 : index
    %0 = vector.load %arg3[%c0, %c0_0] : memref<128x128xf32, #tpu.memory_space<vmem>>, vector<128x128xf32>
    %c0_1 = arith.constant 0 : index
    %c0_2 = arith.constant 0 : index
    %1 = vector.load %arg4[%c0_1, %c0_2] : memref<1x128xf32, #tpu.memory_space<vmem>>, vector<1x128xf32>
    %c0_3 = arith.constant 0 : index
    %c0_4 = arith.constant 0 : index
    %2 = vector.load %arg5[%c0_3, %c0_4] : memref<128x256xf32, #tpu.memory_space<vmem>>, vector<128x256xf32>
    %c0_5 = arith.constant 0 : index
    %c0_6 = arith.constant 0 : index
    %3 = vector.load %arg6[%c0_5, %c0_6] : memref<1x256xf32, #tpu.memory_space<vmem>>, vector<1x256xf32>
    %c0_7 = arith.constant 0 : index
    %c0_8 = arith.constant 0 : index
    %4 = vector.load %arg7[%c0_7, %c0_8] : memref<256x128xf32, #tpu.memory_space<vmem>>, vector<256x128xf32>
    %c0_9 = arith.constant 0 : index
    %c0_10 = arith.constant 0 : index
    %5 = vector.load %arg8[%c0_9, %c0_10] : memref<1x128xf32, #tpu.memory_space<vmem>>, vector<1x128xf32>
    %c0_11 = arith.constant 0 : index
    %c0_12 = arith.constant 0 : index
    %6 = vector.load %arg1[%c0_11, %c0_12] : memref<8x128xf32, #tpu.memory_space<vmem>>, vector<8x128xf32>
    %cst = arith.constant dense<0.000000e+00> : vector<8x128xf32>
    %7 = tpu.matmul %6, %0, %cst {dimension_numbers = #tpu.dot_dimension_numbers<[1], [0], [0], [1], [0, 0, 1, 1], [], []>} : vector<8x128xf32>, vector<128x128xf32>, vector<8x128xf32> -> vector<8x128xf32>
    %8 = vector.broadcast %1 : vector<1x128xf32> to vector<8x128xf32>
    %9 = arith.addf %7, %8 : vector<8x128xf32>
    %cst_13 = arith.constant 0.000000e+00 : f32
    %10 = vector.broadcast %cst_13 : f32 to vector<8x128xf32>
    %11 = arith.maximumf %9, %10 : vector<8x128xf32>
    %cst_14 = arith.constant dense<0.000000e+00> : vector<8x256xf32>
    %12 = tpu.matmul %11, %2, %cst_14 {dimension_numbers = #tpu.dot_dimension_numbers<[1], [0], [0], [1], [0, 0, 1, 1], [], []>} : vector<8x128xf32>, vector<128x256xf32>, vector<8x256xf32> -> vector<8x256xf32>
    %13 = vector.broadcast %3 : vector<1x256xf32> to vector<8x256xf32>
    %14 = arith.addf %12, %13 : vector<8x256xf32>
    %cst_15 = arith.constant 0.000000e+00 : f32
    %15 = vector.broadcast %cst_15 : f32 to vector<8x256xf32>
    %16 = arith.maximumf %14, %15 : vector<8x256xf32>
    %cst_16 = arith.constant dense<0.000000e+00> : vector<8x128xf32>
    %17 = tpu.matmul %16, %4, %cst_16 {dimension_numbers = #tpu.dot_dimension_numbers<[1], [0], [0], [1], [0, 0, 1, 1], [], []>} : vector<8x256xf32>, vector<256x128xf32>, vector<8x128xf32> -> vector<8x128xf32>
    %18 = vector.broadcast %5 : vector<1x128xf32> to vector<8x128xf32>
    %19 = arith.addf %17, %18 : vector<8x128xf32>
    %c0_17 = arith.constant 0 : index
    %c0_18 = arith.constant 0 : index
    %20 = vector.load %arg9[%c0_17, %c0_18] : memref<8x128xf32, #tpu.memory_space<vmem>>, vector<8x128xf32>
    tpu.vector_store %arg9[%c0_17, %c0_18], %19 {strides = array<i32>} : memref<8x128xf32, #tpu.memory_space<vmem>>, vector<8x128xf32>,
    %c0_19 = arith.constant 0 : index
    %c0_20 = arith.constant 0 : index
    %21 = vector.load %arg2[%c0_19, %c0_20] : memref<8x128xf32, #tpu.memory_space<vmem>>, vector<8x128xf32>
    %cst_21 = arith.constant dense<0.000000e+00> : vector<8x128xf32>
    %22 = tpu.matmul %21, %0, %cst_21 {dimension_numbers = #tpu.dot_dimension_numbers<[1], [0], [0], [1], [0, 0, 1, 1], [], []>} : vector<8x128xf32>, vector<128x128xf32>, vector<8x128xf32> -> vector<8x128xf32>
    %23 = vector.broadcast %1 : vector<1x128xf32> to vector<8x128xf32>
    %24 = arith.addf %22, %23 : vector<8x128xf32>
    %cst_22 = arith.constant 0.000000e+00 : f32
    %25 = vector.broadcast %cst_22 : f32 to vector<8x128xf32>
    %26 = arith.maximumf %24, %25 : vector<8x128xf32>
    %cst_23 = arith.constant dense<0.000000e+00> : vector<8x256xf32>
    %27 = tpu.matmul %26, %2, %cst_23 {dimension_numbers = #tpu.dot_dimension_numbers<[1], [0], [0], [1], [0, 0, 1, 1], [], []>} : vector<8x128xf32>, vector<128x256xf32>, vector<8x256xf32> -> vector<8x256xf32>
    %28 = vector.broadcast %3 : vector<1x256xf32> to vector<8x256xf32>
    %29 = arith.addf %27, %28 : vector<8x256xf32>
    %cst_24 = arith.constant 0.000000e+00 : f32
    %30 = vector.broadcast %cst_24 : f32 to vector<8x256xf32>
    %31 = arith.maximumf %29, %30 : vector<8x256xf32>
    %cst_25 = arith.constant dense<0.000000e+00> : vector<8x128xf32>
    %32 = tpu.matmul %31, %4, %cst_25 {dimension_numbers = #tpu.dot_dimension_numbers<[1], [0], [0], [1], [0, 0, 1, 1], [], []>} : vector<8x256xf32>, vector<256x128xf32>, vector<8x128xf32> -> vector<8x128xf32>
    %33 = vector.broadcast %5 : vector<1x128xf32> to vector<8x128xf32>
    %34 = arith.addf %32, %33 : vector<8x128xf32>
    %c0_26 = arith.constant 0 : index
    %c0_27 = arith.constant 0 : index
    %35 = vector.load %arg10[%c0_26, %c0_27] : memref<8x128xf32, #tpu.memory_space<vmem>>, vector<8x128xf32>
    tpu.vector_store %arg10[%c0_26, %c0_27], %34 {strides = array<i32>} : memref<8x128xf32, #tpu.memory_space<vmem>>, vector<8x128xf32>,
    return
  }
  func.func @transform_0(%arg0: i32) -> (i32, i32) {
    %c0_i32 = arith.constant 0 : i32
    %c0_i32_0 = arith.constant 0 : i32
    return %arg0, %c0_i32 : i32, i32
  }
  func.func @transform_1(%arg0: i32) -> (i32, i32) {
    %c0_i32 = arith.constant 0 : i32
    %c0_i32_0 = arith.constant 0 : i32
    return %arg0, %c0_i32 : i32, i32
  }
  func.func @transform_2(%arg0: i32) -> (i32, i32) {
    %c0_i32 = arith.constant 0 : i32
    %c0_i32_0 = arith.constant 0 : i32
    %c0_i32_1 = arith.constant 0 : i32
    return %c0_i32, %c0_i32_0 : i32, i32
  }
  func.func @transform_3(%arg0: i32) -> (i32, i32) {
    %c0_i32 = arith.constant 0 : i32
    %c0_i32_0 = arith.constant 0 : i32
    %c0_i32_1 = arith.constant 0 : i32
    return %c0_i32, %c0_i32_0 : i32, i32
  }
  func.func @transform_4(%arg0: i32) -> (i32, i32) {
    %c0_i32 = arith.constant 0 : i32
    %c0_i32_0 = arith.constant 0 : i32
    %c0_i32_1 = arith.constant 0 : i32
    return %c0_i32, %c0_i32_0 : i32, i32
  }
  func.func @transform_5(%arg0: i32) -> (i32, i32) {
    %c0_i32 = arith.constant 0 : i32
    %c0_i32_0 = arith.constant 0 : i32
    %c0_i32_1 = arith.constant 0 : i32
    return %c0_i32, %c0_i32_0 : i32, i32
  }
  func.func @transform_6(%arg0: i32) -> (i32, i32) {
    %c0_i32 = arith.constant 0 : i32
    %c0_i32_0 = arith.constant 0 : i32
    %c0_i32_1 = arith.constant 0 : i32
    return %c0_i32, %c0_i32_0 : i32, i32
  }
  func.func @transform_7(%arg0: i32) -> (i32, i32) {
    %c0_i32 = arith.constant 0 : i32
    %c0_i32_0 = arith.constant 0 : i32
    %c0_i32_1 = arith.constant 0 : i32
    return %c0_i32, %c0_i32_0 : i32, i32
  }
  func.func @transform_8(%arg0: i32) -> (i32, i32) {
    %c0_i32 = arith.constant 0 : i32
    %c0_i32_0 = arith.constant 0 : i32
    return %arg0, %c0_i32 : i32, i32
  }
  func.func @transform_9(%arg0: i32) -> (i32, i32) {
    %c0_i32 = arith.constant 0 : i32
    %c0_i32_0 = arith.constant 0 : i32
    return %arg0, %c0_i32 : i32, i32
  }
}

</mosaic_0001>

<bundles_post_ra>
// kernel: tpu_custom_call.1
= control target key start
LH: loop header
LB: loop body
LE: loop exit
PB: predicated region body
PF: predicated region fallthrough
CT: control target
= control target key end

     0   :  { %15 = vsyncpa [#allocation3], 0  ;;  %s964_s0 = inlined_call_operand.hbm [shape: f32[8,128], index: 0, kind: input, shape index: {}]   ;;  %s965_s1 = inlined_call_operand.hbm [shape: f32[8,128], index: 1, kind: input, shape index: {}]   ;;  %s966_s2 = inlined_call_operand.hbm [shape: f32[128,128], index: 2, kind: input, shape index: {}]   ;;  %s967_s3 = inlined_call_operand.vmem [shape: f32[1,128], index: 3, kind: input, shape index: {}]   ;;  %s968_s4 = inlined_call_operand.hbm [shape: f32[128,256], index: 4, kind: input, shape index: {}]   ;;  %s969_s5 = inlined_call_operand.vmem [shape: f32[1,256], index: 5, kind: input, shape index: {}]   ;;  %s970_s6 = inlined_call_operand.hbm [shape: f32[256,128], index: 6, kind: input, shape index: {}]   ;;  %s971_s7 = inlined_call_operand.vmem [shape: f32[1,128], index: 7, kind: input, shape index: {}]   ;;  %s972_s8 = inlined_call_operand.hbm [shape: f32[8,128], index: 8, kind: output, shape index: {0}]   ;;  %s973_s9 = inlined_call_operand.hbm [shape: f32[8,128], index: 9, kind: output, shape index: {1}]  }
   0x1   :  { %16 = vsyncpa [#allocation6], 0 }
   0x2   :  { %17 = vsyncpa [#allocation9], 0 }
   0x3   :  { %18 = vsyncpa [#allocation4], 0  ;;  %s36_s11 = sshll.u32 %s965_s1, 4  ;;  %s37_s11 = int_to_ptr.hbm [resolvable:$true] %s36_s11 }
   0x4   :  { %19 = vsyncpa [#allocation13], 0  ;;  %s637_s12 = smov [#allocation5]   ;;  %s61_s16 = sshll.u32 %s968_s4, 4  ;;  %s62_s16 = int_to_ptr.hbm [resolvable:$true] %s61_s16 }
   0x5   :  { %s38_s13 = sshll.u32 %s637_s12, 4  ;;  %s638_s17 = smov [#allocation8]   ;;  %s39_s13 = int_to_ptr.vmem [resolvable:$true] %s38_s13 }
   0x6   :  { %41 = dma.hbm_to_vmem [thread:$0]  %s37_s11, 128, %s39_s13, [#allocation6]  }
   0x7   :  { %s63_s18 = sshll.u32 %s638_s17, 4  ;;  %s639_s19 = smov 256   ;;  %s64_s18 = int_to_ptr.vmem [resolvable:$true] %s63_s18 }
   0x8   :  { %s640_s20 = smov 16   ;;  %s25_s1 = sshll.u32 %s964_s0, 4  ;;  %s26_s1 = int_to_ptr.hbm [resolvable:$true] %s25_s1 }
   0x9   :  { %69 = dma.hbm_to_vmem [thread:$0]  %s62_s16, 4096, %s64_s18, [#allocation9], %s639_s19, %s639_s19, %s640_s20  }
   0xa   :  { %s641_s23 = smov [#allocation2]   ;;  %s46_s4 = sshll.u32 %s966_s2, 4  ;;  %s47_s4 = int_to_ptr.hbm [resolvable:$true] %s46_s4 }
   0xb   :  { %s27_s24 = sshll.u32 %s641_s23, 4  ;;  %s642_s27 = smov [#allocation7]   ;;  %s28_s24 = int_to_ptr.vmem [resolvable:$true] %s27_s24 }
   0xc   :  { %30 = dma.hbm_to_vmem [thread:$0]  %s26_s1, 128, %s28_s24, [#allocation3]  }
   0xd   :  { %s48_s28 = sshll.u32 %s642_s27, 4  ;;  %s643_s29 = smov 128   ;;  %s49_s28 = int_to_ptr.vmem [resolvable:$true] %s48_s28 }
   0xe   :  { %s644_s30 = smov 8   ;;  %s76_s0 = sshll.u32 %s970_s6, 4  ;;  %s77_s0 = int_to_ptr.hbm [resolvable:$true] %s76_s0 }
   0xf   :  { %54 = dma.hbm_to_vmem [thread:$0]  %s47_s4, 2048, %s49_s28, [#allocation6], %s643_s29, %s643_s29, %s644_s30  }
  0x10   :  { %s645_s12 = smov [#allocation10]  }
  0x11   :  { %s78_s13 = sshll.u32 %s645_s12, 4  ;;  %s79_s13 = int_to_ptr.vmem [resolvable:$true] %s78_s13 }
  0x12   :  { %84 = dma.hbm_to_vmem [thread:$0]  %s77_s0, 4096, %s79_s13, [#allocation9], %s643_s29, %s643_s29, %s644_s30  }
  0x13   :  { %627 = dma.done.wait [#allocation3], 128  }
  0x14   :  { %628 = vsyncadd [#allocation3], 4294967168 }
  0x15   :  { %629 = dma.done.wait [#allocation6], 2176  }
  0x16   :  { %630 = vsyncadd [#allocation6], 4294965120 }
  0x17   :  { %631 = dma.done.wait [#allocation9], 8192  }
  0x18   :  { %632 = vsyncadd [#allocation9], 4294959104  ;;  %v713_v0 = vld [vmem:[#allocation7 + $0x78] sm:$0xff]  ;;  %v715_v1 = vld [vmem:[#allocation7 + $0x70] sm:$0xff]  ;;  %s646_s16 = smov [#allocation11]   ;;  %s418_s20 = sshll.u32 %s972_s8, 4  ;;  %s419_s20 = int_to_ptr.hbm [resolvable:$true] %s418_s20 }
  0x19   :  { %194 = vmatpush.msra.mxu0 %v713_v0  ;;  %v718_v2 = vld [vmem:[#allocation7 + $0x68] sm:$0xff]  ;;  %v721_v3 = vld [vmem:[#allocation7 + $0x60] sm:$0xff]  ;;  %v724_v4 = vld [vmem:[#allocation8 + $0xf0] sm:$0xff]  ;;  %s416_s17 = sshll.u32 %s646_s16, 4  ;;  %s429_s23 = sshll.u32 %s973_s9, 4  ;;  %s417_s17 = int_to_ptr.vmem [resolvable:$true] %s416_s17  ;;  %s430_s23 = int_to_ptr.hbm [resolvable:$true] %s429_s23 }
  0x1a   :  { %v726_v5 = vld [vmem:[#allocation7 + $0x58] sm:$0xff]  ;;  %220 = vmatpush.msra.mxu1 %v724_v4  ;;  %v729_v6 = vld [vmem:[#allocation8 + $0xe0] sm:$0xff]  ;;  %v732_v7 = vld [vmem:[#allocation8 + $0xd0] sm:$0xff] }
  0x1b   :  { %195 = vmatpush.msra.mxu0 %v715_v1  ;;  %v734_v8 = vld [vmem:[#allocation7 + $0x50] sm:$0xff]  ;;  %v738_v9 = vld [vmem:[#allocation8 + $0xc0] sm:$0xff]  ;;  %v740_v10 = vld [vmem:[#allocation8 + $0xf8] sm:$0xff] }
  0x1c   :  { %221 = vmatpush.msra.mxu1 %v729_v6  ;;  %v742_v11 = vld [vmem:[#allocation7 + $0x48] sm:$0xff]  ;;  %240 = vmatpush.msra.mxu2 %v740_v10  ;;  %v749_v13 = vld [vmem:[#allocation8 + $0xb0] sm:$0xff]  ;;  %v751_v14 = vld [vmem:[#allocation8 + $0xd8] sm:$0xff] }
  0x1d   :  { %196 = vmatpush.msra.mxu0 %v718_v2  ;;  %v746_v12 = vld [vmem:[#allocation8 + $0xe8] sm:$0xff]  ;;  %v753_v15 = vld [vmem:[#allocation7 + $0x40] sm:$0xff]  ;;  %v762_v18 = vld [vmem:[#allocation7 + $0x38] sm:$0xff] }
  0x1e   :  { %222 = vmatpush.msra.mxu1 %v732_v7  ;;  %241 = vmatpush.msra.mxu2 %v746_v12  ;;  %v758_v16 = vld [vmem:[#allocation8 + $0xa0] sm:$0xff]  ;;  %v760_v17 = vld [vmem:[#allocation8 + $0xc8] sm:$0xff]  ;;  %v767_v19 = vld [vmem:[#allocation8 + $0x90] sm:$0xff] }
  0x1f   :  { %197 = vmatpush.msra.mxu0 %v721_v3  ;;  %v769_v20 = vld [vmem:[#allocation8 + $0xb8] sm:$0xff]  ;;  %v771_v21 = vld [vmem:[#allocation7 + $0x30] sm:$0xff]  ;;  %v776_v22 = vld [vmem:[#allocation8 + $0x80] sm:$0xff] }
  0x20   :  { %223 = vmatpush.msra.mxu1 %v738_v9  ;;  %242 = vmatpush.msra.mxu2 %v751_v14  ;;  %v778_v23 = vld [vmem:[#allocation8 + $0xa8] sm:$0xff]  ;;  %v783_v25 = vld [vmem:[#allocation8 + $0x70] sm:$0xff]  ;;  %v785_v26 = vld [vmem:[#allocation8 + $0x98] sm:$0xff] }
  0x21   :  { %198 = vmatpush.msra.mxu0 %v726_v5  ;;  %v112_v24 = vld [vmem:[#allocation7 + $0x28] sm:$0xff]  ;;  %v111_v27 = vld [vmem:[#allocation7 + $0x20] sm:$0xff]  ;;  %v110_v30 = vld [vmem:[#allocation7 + $0x18] sm:$0xff] }
  0x22   :  { %224 = vmatpush.msra.mxu1 %v749_v13  ;;  %243 = vmatpush.msra.mxu2 %v760_v17  ;;  %v789_v28 = vld [vmem:[#allocation8 + $0x60] sm:$0xff]  ;;  %v791_v29 = vld [vmem:[#allocation8 + $0x88] sm:$0xff]  ;;  %v795_v31 = vld [vmem:[#allocation8 + $0x50] sm:$0xff] }
  0x23   :  { %199 = vmatpush.msra.mxu0 %v734_v8  ;;  %v797_v32 = vld [vmem:[#allocation8 + $0x78] sm:$0xff]  ;;  %v109_v33 = vld [vmem:[#allocation7 + $0x10] sm:$0xff]  ;;  %v801_v34 = vld [vmem:[#allocation8 + $0x40] sm:$0xff] }
  0x24   :  { %225 = vmatpush.msra.mxu1 %v758_v16  ;;  %244 = vmatpush.msra.mxu2 %v769_v20  ;;  %v803_v35 = vld [vmem:[#allocation8 + $0x68] sm:$0xff]  ;;  %v807_v37 = vld [vmem:[#allocation8 + $0x30] sm:$0xff]  ;;  %v809_v38 = vld [vmem:[#allocation8 + $0x58] sm:$0xff] }
  0x25   :  { %200 = vmatpush.msra.mxu0 %v742_v11  ;;  %v108_v36 = vld [vmem:[#allocation7 + $0x8] sm:$0xff]  ;;  %v107_v39 = vld [vmem:[#allocation7] sm:$0xff]  ;;  %v190_v40 = vld [vmem:[#allocation2] sm:$0xff] }
  0x26   :  { %226 = vmatpush.msra.mxu1 %v767_v19  ;;  %245 = vmatpush.msra.mxu2 %v778_v23  ;;  %v813_v41 = vld [vmem:[#allocation8 + $0x20] sm:$0xff]  ;;  %v817_v42 = vld [vmem:[#allocation8 + $0x48] sm:$0xff]  ;;  %v819_v43 = vld [vmem:[#allocation8 + $0x10] sm:$0xff] }
  0x27   :  { %201 = vmatpush.msra.mxu0 %v753_v15  ;;  %v822_v44 = vld [vmem:[#allocation8 + $0x38] sm:$0xff]  ;;  %v824_v45 = vld [vmem:[#allocation8] sm:$0xff]  ;;  %v840_v46 = vld [vmem:[#allocation8 + $0x28] sm:$0xff] }
  0x28   :  { %227 = vmatpush.msra.mxu1 %v776_v22  ;;  %246 = vmatpush.msra.mxu2 %v785_v26  ;;  %v843_v47 = vld [vmem:[#allocation8 + $0x18] sm:$0xff]  ;;  %v846_v48 = vld [vmem:[#allocation8 + $0x8] sm:$0xff]  ;;  %v855_v50 = vld [vmem:[#allocation10 + $0x70] sm:$0xff] }
  0x29   :  { %202 = vmatpush.msra.mxu0 %v762_v18  ;;  %v853_v49 = vld [vmem:[#allocation10 + $0x78] sm:$0xff]  ;;  %v859_v51 = vld [vmem:[#allocation10 + $0x68] sm:$0xff]  ;;  %v863_v52 = vld [vmem:[#allocation10 + $0x60] sm:$0xff] }
  0x2a   :  { %228 = vmatpush.msra.mxu1 %v783_v25  ;;  %247 = vmatpush.msra.mxu2 %v791_v29  ;;  %v188_v53 = vld [vmem:[#allocation10 + $0xf8] sm:$0xff]  ;;  %v187_v54 = vld [vmem:[#allocation10 + $0xf0] sm:$0xff]  ;;  %v186_v56 = vld [vmem:[#allocation10 + $0xe8] sm:$0xff] }
  0x2b   :  { %203 = vmatpush.msra.mxu0 %v771_v21  ;;  %265 = vmatpush.msra.mxu3 %v853_v49  ;;  %v867_v55 = vld [vmem:[#allocation10 + $0x58] sm:$0xff]  ;;  %v871_v57 = vld [vmem:[#allocation10 + $0x50] sm:$0xff]  ;;  %v185_v58 = vld [vmem:[#allocation10 + $0xe0] sm:$0xff] }
  0x2c   :  { %229 = vmatpush.msra.mxu1 %v789_v28  ;;  %248 = vmatpush.msra.mxu2 %v797_v32  ;;  %v875_v59 = vld [vmem:[#allocation10 + $0x48] sm:$0xff]  ;;  %v184_v60 = vld [vmem:[#allocation10 + $0xd8] sm:$0xff]  ;;  %v879_v61 = vld [vmem:[#allocation10 + $0x40] sm:$0xff] }
  0x2d   :  { %204 = vmatpush.msra.mxu0 %v112_v24  ;;  %266 = vmatpush.msra.mxu3 %v855_v50  ;;  %v183_v62 = vld [vmem:[#allocation10 + $0xd0] sm:$0xff]  ;;  %v883_v63 = vld [vmem:[#allocation10 + $0x38] sm:$0xff] }
  0x2e   :  { %230 = vmatpush.msra.mxu1 %v795_v31  ;;  %249 = vmatpush.msra.mxu2 %v803_v35 }
  0x2f   :  { %205 = vmatpush.msra.mxu0 %v111_v27  ;;  %267 = vmatpush.msra.mxu3 %v859_v51 }
  0x30   :  { %231 = vmatpush.msra.mxu1 %v801_v34  ;;  %250 = vmatpush.msra.mxu2 %v809_v38 }
  0x31   :  { %206 = vmatpush.msra.mxu0 %v110_v30  ;;  %268 = vmatpush.msra.mxu3 %v863_v52 }
  0x32   :  { %232 = vmatpush.msra.mxu1 %v807_v37  ;;  %251 = vmatpush.msra.mxu2 %v817_v42 }
  0x33   :  { %207 = vmatpush.msra.mxu0 %v109_v33  ;;  %269 = vmatpush.msra.mxu3 %v867_v55 }
  0x34   :  { %233 = vmatpush.msra.mxu1 %v813_v41  ;;  %252 = vmatpush.msra.mxu2 %v822_v44 }
  0x35   :  { %208 = vmatpush.msra.mxu0 %v108_v36  ;;  %270 = vmatpush.msra.mxu3 %v871_v57 }
  0x36   :  { %234 = vmatpush.msra.mxu1 %v819_v43  ;;  %253 = vmatpush.msra.mxu2 %v840_v46 }
  0x37   :  { %209 = vmatpush.msra.mxu0 %v107_v39  ;;  %271 = vmatpush.msra.mxu3 %v875_v59 }
  0x38   :  { %210 = vmatmul.f32.vlgmr.msra.gmra.mxu0 %v190_v40  ;;  %235 = vmatpush.msra.mxu1 %v824_v45 }
  0x39   :  { %254 = vmatpush.msra.mxu2 %v843_v47  ;;  %285 = vmatpush.msrb.mxu0 %v188_v53 }
  0x3a   :  { %307 = vmatpush.msrb.mxu1 %v713_v0  ;;  %272 = vmatpush.msra.mxu3 %v879_v61  ;;  %v182_v0 = vld [vmem:[#allocation10 + $0xc8] sm:$0xff] }
  0x3b   :  { %255 = vmatpush.msra.mxu2 %v846_v48  ;;  %286 = vmatpush.msrb.mxu0 %v187_v54 }
  0x3c   :  { %308 = vmatpush.msrb.mxu1 %v715_v1  ;;  %v890_v1 = vld [vmem:[%s967_s3] ss:$0 sm:$0xff]  ;;  %273 = vmatpush.msra.mxu3 %v883_v63 }
  0x3d   :  { %328 = vmatpush.msrb.mxu2 %v724_v4  ;;  %287 = vmatpush.msrb.mxu0 %v186_v56  ;;  %v896_v4 = vld [vmem:[#allocation10 + $0x28] sm:$0xff] }
  0x3e   :  { %309 = vmatpush.msrb.mxu1 %v718_v2  ;;  %v892_v2 = vld [vmem:[#allocation10 + $0x30] sm:$0xff] }
  0x3f   :  { %329 = vmatpush.msrb.mxu2 %v729_v6  ;;  %288 = vmatpush.msrb.mxu0 %v185_v58  ;;  %v180_v6 = vld [vmem:[#allocation10 + $0xb8] sm:$0xff] }
  0x40   :  { %310 = vmatpush.msrb.mxu1 %v721_v3  ;;  %v181_v3 = vld [vmem:[#allocation10 + $0xc0] sm:$0xff]  ;;  %274 = vmatpush.msra.mxu3 %v892_v2 }
  0x41   :  { %330 = vmatpush.msrb.mxu2 %v732_v7  ;;  %289 = vmatpush.msrb.mxu0 %v184_v60 }
  0x42   :  { %311 = vmatpush.msrb.mxu1 %v726_v5  ;;  %275 = vmatpush.msra.mxu3 %v896_v4 }
  0x43   :  { %331 = vmatpush.msrb.mxu2 %v738_v9  ;;  %290 = vmatpush.msrb.mxu0 %v183_v62 }
  0x44   :  { %312 = vmatpush.msrb.mxu1 %v734_v8  ;;  %v901_v8 = vld [vmem:[#allocation10 + $0x20] sm:$0xff] }
  0x45   :  { %332 = vmatpush.msrb.mxu2 %v749_v13  ;;  %291 = vmatpush.msrb.mxu0 %v182_v0  ;;  %v179_v13 = vld [vmem:[#allocation10 + $0xb0] sm:$0xff] }
  0x46   :  { %313 = vmatpush.msrb.mxu1 %v742_v11  ;;  %v905_v11 = vld [vmem:[#allocation10 + $0x18] sm:$0xff]  ;;  %276 = vmatpush.msra.mxu3 %v901_v8 }
  0x47   :  { %333 = vmatpush.msrb.mxu2 %v758_v16  ;;  %292 = vmatpush.msrb.mxu0 %v181_v3  ;;  %v912_v16 = vld [vmem:[#allocation10 + $0x8] sm:$0xff] }
  0x48   :  { %314 = vmatpush.msrb.mxu1 %v753_v15  ;;  %v909_v15 = vld [vmem:[#allocation10 + $0x10] sm:$0xff]  ;;  %277 = vmatpush.msra.mxu3 %v905_v11 }
  0x49   :  { %334 = vmatpush.msrb.mxu2 %v767_v19  ;;  %293 = vmatpush.msrb.mxu0 %v180_v6  ;;  %v306_v19 = vld [vmem:[#allocation5] sm:$0xff] }
  0x4a   :  { %315 = vmatpush.msrb.mxu1 %v762_v18  ;;  %278 = vmatpush.msra.mxu3 %v909_v15  ;;  %v915_v18 = vld [vmem:[#allocation10] sm:$0xff] }
  0x4b   :  { %335 = vmatpush.msrb.mxu2 %v776_v22  ;;  %294 = vmatpush.msrb.mxu0 %v179_v13  ;;  %v156_v22 = vld [vmem:[%s969_s5] sm:$0x3] }
  0x4c   :  { %316 = vmatpush.msrb.mxu1 %v771_v21  ;;  %279 = vmatpush.msra.mxu3 %v912_v16  ;;  %v173_v21 = vld [vmem:[#allocation10 + $0x80] sm:$0xff] }
  0x4d   :  { %336 = vmatpush.msrb.mxu2 %v783_v25 }
  0x4e   :  { %317 = vmatpush.msrb.mxu1 %v112_v24  ;;  %280 = vmatpush.msra.mxu3 %v915_v18 }
  0x4f   :  { %337 = vmatpush.msrb.mxu2 %v789_v28 }
  0x50   :  { %318 = vmatpush.msrb.mxu1 %v111_v27  ;;  %348 = vmatpush.msrb.mxu3 %v740_v10  ;;  %v178_v10 = vld [vmem:[#allocation10 + $0xa8] sm:$0xff]  ;;  %v217_v27 = vperm.slane %v156_v22, 1 }
  0x51   :  { %338 = vmatpush.msrb.mxu2 %v795_v31  ;;  %295 = vmatpush.msrb.mxu0 %v178_v10 }
  0x52   :  { %319 = vmatpush.msrb.mxu1 %v110_v30  ;;  %349 = vmatpush.msrb.mxu3 %v746_v12  ;;  %v177_v12 = vld [vmem:[#allocation10 + $0xa0] sm:$0xff] }
  0x53   :  { %339 = vmatpush.msrb.mxu2 %v801_v34  ;;  %296 = vmatpush.msrb.mxu0 %v177_v12  ;;  %v458_v34 = vld [vmem:[%s971_s7] ss:$0 sm:$0xff]  ;;  %s647_s7 = smov [#allocation12]  }
  0x54   :  { %320 = vmatpush.msrb.mxu1 %v109_v33  ;;  %350 = vmatpush.msrb.mxu3 %v751_v14  ;;  %v176_v14 = vld [vmem:[#allocation10 + $0x98] sm:$0xff]  ;;  %s427_s21 = sshll.u32 %s647_s7, 4  ;;  %s428_s21 = int_to_ptr.vmem [resolvable:$true] %s427_s21 }
  0x55   :  { %340 = vmatpush.msrb.mxu2 %v807_v37  ;;  %297 = vmatpush.msrb.mxu0 %v176_v14 }
  0x56   :  { %321 = vmatpush.msrb.mxu1 %v108_v36  ;;  %351 = vmatpush.msrb.mxu3 %v760_v17  ;;  %v175_v17 = vld [vmem:[#allocation10 + $0x90] sm:$0xff] }
  0x57   :  { %341 = vmatpush.msrb.mxu2 %v813_v41  ;;  %298 = vmatpush.msrb.mxu0 %v175_v17 }
  0x58   :  { %322 = vmatpush.msrb.mxu1 %v107_v39  ;;  %352 = vmatpush.msrb.mxu3 %v769_v20  ;;  %v174_v20 = vld [vmem:[#allocation10 + $0x88] sm:$0xff] }
  0x59   :  { %342 = vmatpush.msrb.mxu2 %v819_v43  ;;  %299 = vmatpush.msrb.mxu0 %v174_v20 }
  0x5a   :  { %353 = vmatpush.msrb.mxu3 %v778_v23  ;;  %v216_v23 = vperm.slane %v156_v22, 0 }
  0x5b   :  { %343 = vmatpush.msrb.mxu2 %v824_v45  ;;  %300 = vmatpush.msrb.mxu0 %v173_v21 }
  0x5c   :  { %354 = vmatpush.msrb.mxu3 %v785_v26 }
  0x5d   :  { %370 = vmatpush.msra.mxu0 %v853_v49 }
  0x5e   :  { %355 = vmatpush.msrb.mxu3 %v791_v29 }
  0x5f   :  { %371 = vmatpush.msra.mxu0 %v855_v50 }
  0x60   :  { %356 = vmatpush.msrb.mxu3 %v797_v32 }
  0x61   :  { %372 = vmatpush.msra.mxu0 %v859_v51 }
  0x62   :  { %357 = vmatpush.msrb.mxu3 %v803_v35 }
  0x63   :  { %373 = vmatpush.msra.mxu0 %v863_v52 }
  0x64   :  { %358 = vmatpush.msrb.mxu3 %v809_v38 }
  0x65   :  { %374 = vmatpush.msra.mxu0 %v867_v55 }
  0x66   :  { %359 = vmatpush.msrb.mxu3 %v817_v42 }
  0x67   :  { %375 = vmatpush.msra.mxu0 %v871_v57 }
  0x68   :  { %360 = vmatpush.msrb.mxu3 %v822_v44 }
  0x69   :  { %376 = vmatpush.msra.mxu0 %v875_v59 }
  0x6a   :  { %361 = vmatpush.msrb.mxu3 %v840_v46 }
  0x6b   :  { %377 = vmatpush.msra.mxu0 %v879_v61 }
  0x6c   :  { %362 = vmatpush.msrb.mxu3 %v843_v47 }
  0x6d   :  { %378 = vmatpush.msra.mxu0 %v883_v63 }
  0x6e   :  { %363 = vmatpush.msrb.mxu3 %v846_v48 }
  0x6f   :  { %379 = vmatpush.msra.mxu0 %v892_v2 }
  0x71   :  { %380 = vmatpush.msra.mxu0 %v896_v4 }
  0x73   :  { %381 = vmatpush.msra.mxu0 %v901_v8 }
  0x75   :  { %382 = vmatpush.msra.mxu0 %v905_v11 }
  0x77   :  { %383 = vmatpush.msra.mxu0 %v909_v15 }
  0x79   :  { %384 = vmatpush.msra.mxu0 %v912_v16 }
  0x7b   :  { %385 = vmatpush.msra.mxu0 %v915_v18 }
  0xb5   :  { %v211_v5 = vpop.f32.mrf.mxu0 }
  0xb6   :  { %v212_v7 = vadd.f32 %v890_v1, %v211_v5 }
  0xb8   :  { %v214_v9 = vmax.f32 %v212_v7, 0.0 }
  0xba   :  { %236 = vmatmul.f32.vlgmr.msra.gmra.mxu1 %v214_v9  ;;  %256 = vmatmul.f32.vlgmr.msra.gmra.mxu2 %v214_v9 }
  0xbb   :  { %390 = vmatpush.msra.mxu1 %v188_v53 }
  0xbd   :  { %391 = vmatpush.msra.mxu1 %v187_v54 }
  0xbf   :  { %392 = vmatpush.msra.mxu1 %v186_v56 }
  0xc1   :  { %393 = vmatpush.msra.mxu1 %v185_v58 }
  0xc2   :  { %323 = vmatmul.f32.vlgmr.msrb.gmra.mxu1 %v306_v19 }
  0xc3   :  { %394 = vmatpush.msra.mxu1 %v184_v60 }
  0xc5   :  { %395 = vmatpush.msra.mxu1 %v183_v62 }
  0xc7   :  { %396 = vmatpush.msra.mxu1 %v182_v0 }
  0xc9   :  { %397 = vmatpush.msra.mxu1 %v181_v3 }
  0xcb   :  { %398 = vmatpush.msra.mxu1 %v180_v6 }
  0xcd   :  { %399 = vmatpush.msra.mxu1 %v179_v13 }
  0xcf   :  { %400 = vmatpush.msra.mxu1 %v178_v10 }
  0xd1   :  { %401 = vmatpush.msra.mxu1 %v177_v12 }
  0xd3   :  { %402 = vmatpush.msra.mxu1 %v176_v14 }
  0xd5   :  { %403 = vmatpush.msra.mxu1 %v175_v17 }
  0xd7   :  { %404 = vmatpush.msra.mxu1 %v174_v20 }
  0xd9   :  { %405 = vmatpush.msra.mxu1 %v173_v21 }
 0x137   :  { %v237_v24 = vpop.f32.mrf.mxu1 }
 0x138   :  { %v238_v25 = vadd.f32 %v237_v24, %v216_v23 }
 0x13a   :  { %v260_v26 = vmax.f32 %v238_v25, 0.0 }
 0x13c   :  { %281 = vmatmul.f32.vlgmr.msra.gmra.mxu3 %v260_v26 }
 0x13d   :  { %v257_v28 = vpop.f32.mrf.mxu2 }
 0x13e   :  { %v258_v29 = vadd.f32 %v257_v28, %v217_v27 }
 0x13f   :  { %v324_v30 = vpop.f32.mrf.mxu1 }
 0x140   :  { %v261_v31 = vmax.f32 %v258_v29, 0.0  ;;  %v325_v32 = vadd.f32 %v890_v1, %v324_v30 }
 0x142   :  { %v327_v33 = vmax.f32 %v325_v32, 0.0  ;;  %301 = vmatmul.f32.vlgmr.msrb.gmra.mxu0 %v261_v31 }
 0x144   :  { %344 = vmatmul.f32.vlgmr.msrb.gmra.mxu2 %v327_v33  ;;  %364 = vmatmul.f32.vlgmr.msrb.gmra.mxu3 %v327_v33 }
 0x1bf   :  { %v282_v35 = vpop.f32.mrf.mxu3  ;;  %v302_v37 = vpop.f32.mrf.mxu0 }
 0x1c0   :  { %v283_v36 = vadd.f32 %v458_v34, %v282_v35 }
 0x1c2   :  { %v303_v38 = vadd.f32 %v302_v37, %v283_v36 }
 0x1c4   :  { %305 = vst [vmem:[#allocation11] sm:$0xff] %v303_v38 }
 0x1c5   :  { %421 = dma.vmem_to_hbm [thread:$0]  %s417_s17, 128, %s419_s20, [#allocation4]  }
 0x1c7   :  { %v345_v39 = vpop.f32.mrf.mxu2  ;;  %v365_v40 = vpop.f32.mrf.mxu3 }
 0x1c8   :  { %v346_v41 = vadd.f32 %v345_v39, %v216_v23  ;;  %v366_v42 = vadd.f32 %v365_v40, %v217_v27 }
 0x1ca   :  { %v368_v43 = vmax.f32 %v346_v41, 0.0  ;;  %v369_v44 = vmax.f32 %v366_v42, 0.0 }
 0x1cc   :  { %386 = vmatmul.f32.vlgmr.msra.gmra.mxu0 %v368_v43  ;;  %406 = vmatmul.f32.vlgmr.msra.gmra.mxu1 %v369_v44 }
 0x249   :  { %v387_v45 = vpop.f32.mrf.mxu0  ;;  %v407_v47 = vpop.f32.mrf.mxu1 }
 0x24a   :  { %v388_v46 = vadd.f32 %v458_v34, %v387_v45 }
 0x24c   :  { %v408_v48 = vadd.f32 %v407_v47, %v388_v46 }
 0x24e   :  { %410 = vst [vmem:[#allocation12] sm:$0xff] %v408_v48 }
 0x24f   :  { %432 = dma.vmem_to_hbm [thread:$0]  %s428_s21, 128, %s430_s23, [#allocation13]  }
 0x250   :  { %633 = dma.done.wait [#allocation4], 128  }
 0x251   :  { %634 = vsyncadd [#allocation4], 4294967168 }
 0x252   :  { %635 = dma.done.wait [#allocation13], 128  }
 0x253   :  { %636 = vsyncadd [#allocation13], 4294967168 }
 0x254   :  { %441 = vsyncpa [#allocation3], 1 }
 0x255   :  { %442 = vsyncpa [#allocation6], 1 }
 0x256   :  { %443 = vsyncpa [#allocation9], 1 }
 0x257   :  { %444 = vsyncpa [#allocation4], 1 }
 0x258   :  { %445 = vsyncpa [#allocation13], 1 }

</bundles_post_ra>
